<compile_context>
chip_gen: v7x
topology: tpu7x:2x2x1
jax: 0.10.0
libtpu: 0.0.40
codegen_flags: <defaults>
</compile_context>

<pallas_src>
import functools

import jax
import jax.numpy as jnp
import numpy as np
from jax.experimental import pallas as pl
from jax.experimental.pallas import tpu as pltpu


def _round_up(n, m):
    return ((n + m - 1) // m) * m


def _pad2d(a, rows, cols):
    """Zero-pad a 2D array up to (rows, cols)."""
    out = jnp.zeros((rows, cols), a.dtype)
    return out.at[: a.shape[0], : a.shape[1]].set(a)


# -----------------------------------------------------------------------------
# Fused MLP kernel: the entire decoder (all hidden Linear+ReLU layers plus the
# final Linear) in one kernel invocation per batch tile. Weights/biases are
# full-array VMEM-resident blocks; activations never leave the chip.
# -----------------------------------------------------------------------------
def _fused_mlp_kernel(*refs, n_hidden):
    # refs layout (per batch tile):
    #   x_ref [Bt, Ip]                     bf16   (z|c, padded)
    #   (W_t [K_p, N_p] bf16, b_t [1, N_p] f32)   for t = 0..n_hidden
    #                                             (last pair = output layer)
    #   o_ref [Bt, Xp]                     f32
    x_ref = refs[0]
    o_ref = refs[-1]
    params = refs[1:-1]

    h = x_ref[...]                               # bf16 activations feed the MXU
    pos = 0
    for _ in range(n_hidden):                    # hidden layers (static unroll)
        w, b = params[pos], params[pos + 1]
        pos += 2
        acc = jnp.dot(h, w[...], preferred_element_type=jnp.float32) + b[...]
        h = jnp.maximum(acc, 0.0).astype(jnp.bfloat16)   # f32 VPU math, bf16 carry

    # Final linear: no activation (the PyTorch forward never applies sigmoid).
    w, b = params[pos], params[pos + 1]
    out = jnp.dot(h, w[...], preferred_element_type=jnp.float32) + b[...]
    o_ref[...] = out.astype(o_ref.dtype)


# -----------------------------------------------------------------------------
# Decoder wrapper: parameter init (PyTorch nn.Linear default init), padding /
# bf16 casting done ONCE at construction, single fused pallas_call per forward.
# -----------------------------------------------------------------------------
class DecoderPallas:
    def __init__(self, *, z_dim, c_embedded, decoder_dims, x_dim, conditional,
                 key=jax.random.PRNGKey(0)):
        assert len(decoder_dims) >= 1, "decoder_dims must have at least one layer"
        self.conditional = bool(conditional)
        self.z_dim = int(z_dim)
        self.c_dim = int(c_embedded) if self.conditional else 0
        self.x_dim = int(x_dim)
        self.n_hidden = len(decoder_dims)

        init_dim = self.z_dim + self.c_dim
        layers_dim = [init_dim] + list(decoder_dims)

        # ---- PyTorch nn.Linear default init: U(-1/sqrt(in), 1/sqrt(in)) ----
        raw = []
        for in_dim, out_dim in zip(layers_dim[:-1], layers_dim[1:]):
            key, kw, kb = jax.random.split(key, 3)
            bound = 1.0 / np.sqrt(in_dim)
            W = jax.random.uniform(kw, (in_dim, out_dim), jnp.float32, -bound, bound)
            b = jax.random.uniform(kb, (out_dim,), jnp.float32, -bound, bound)
            raw.append((W, b))
        key, kw, kb = jax.random.split(key, 3)
        bound = 1.0 / np.sqrt(layers_dim[-1])
        raw.append((jax.random.uniform(kw, (layers_dim[-1], x_dim), jnp.float32,
                                       -bound, bound),
                    jax.random.uniform(kb, (x_dim,), jnp.float32, -bound, bound)))
        # NOTE: the PyTorch module defines self.sigmoid but never applies it in
        # forward(); faithfully omitted here.

        # Pure-JAX reference params: same bf16 rounding as the kernel.
        self._ref_params = [(W.astype(jnp.bfloat16).astype(jnp.float32), b)
                            for (W, b) in raw]

        # ---- Lane-dense, zero-padded kernel params (bf16 W, f32 bias rows) --
        self.Ip = _round_up(max(init_dim, 1), 128)
        self.dims_p = [_round_up(d, 128) for d in decoder_dims]
        self.Xp = _round_up(x_dim, 128)
        k_dims = [self.Ip] + self.dims_p
        n_dims = self.dims_p + [self.Xp]

        flat = []
        for (W, b), kp, np_ in zip(raw, k_dims, n_dims):
            flat.append(_pad2d(W, kp, np_).astype(jnp.bfloat16))
            flat.append(_pad2d(b.reshape(1, -1), 1, np_))        # f32 bias row
        self.flat_params = flat

        self._param_bytes = int(sum(int(np.prod(p.shape)) * p.dtype.itemsize
                                    for p in flat))
        self._flops_per_row = int(2 * sum(k * n for k, n in zip(k_dims, n_dims)))

        # Physical VMEM cap for vmem_limit_bytes clamping (conservative default).
        try:
            self._vmem_cap = int(0.9 * pltpu.get_tpu_info().vmem_capacity_bytes)
        except Exception:
            self._vmem_cap = 48 << 20
        self._vmem_cap = max(self._vmem_cap, 32 << 20)

        self._fwd_cache = {}
        self._use_buffered = None   # resolved on first call (fallback if unsupported)

    # ----------------------------------------------------------------------- #
    def _pick_bt(self, B):
        B = max(int(B), 1)
        if B <= 256:
            return _round_up(B, 16)          # minimal padding, bf16 (16,128) tile
        # >= 2 batch tiles so the "parallel" axis can shard across 2 TCs (v7x).
        return min(512, _round_up((B + 1) // 2, 16))

    def _forward_impl(self, params, *args, buffered):
        if self.conditional:
            z, c = args
            x = jnp.concatenate([z, c], axis=1)      # single fused input
        else:
            (z,) = args
            x = z
        x = x.astype(jnp.bfloat16)                   # bf16 activations into MXU
        B = x.shape[0]
        Bt = self._pick_bt(B)
        B_pad = _round_up(B, Bt)
        x_pad = jnp.zeros((B_pad, self.Ip), jnp.bfloat16).at[:B, :x.shape[1]].set(x)

        in_specs = [pl.BlockSpec((Bt, self.Ip), lambda i: (i, 0))]
        wkw = dict(pipeline_mode=pl.Buffered(1)) if buffered else {}
        for p in params:
            # Full-array weight/bias block, resident across the batch grid
            # (constant index_map -> no re-DMA; Buffered(1) -> no 2x VMEM).
            in_specs.append(pl.BlockSpec(p.shape, lambda i: (0, 0), **wkw))

        # Explicit VMEM budget: resident params + pipelined I/O tiles + acts.
        max_dim = max([self.Ip, self.Xp] + self.dims_p)
        weight_vmem = self._param_bytes * (1 if buffered else 2)
        io_vmem = 2 * (Bt * self.Ip * 2 + Bt * self.Xp * 4)
        act_vmem = 2 * Bt * max_dim * 6              # f32 acc + bf16 carry, 2 live
        vmem_limit = int(min(max(2 * (weight_vmem + io_vmem + act_vmem), 32 << 20),
                             self._vmem_cap))

        cost = pl.CostEstimate(
            flops=self._flops_per_row * B_pad,
            transcendentals=0,
            bytes_accessed=self._param_bytes + B_pad * self.Ip * 2
                           + B_pad * self.Xp * 4)

        out = pl.pallas_call(
            functools.partial(_fused_mlp_kernel, n_hidden=self.n_hidden),
            grid=(B_pad // Bt,),
            out_shape=jax.ShapeDtypeStruct((B_pad, self.Xp), jnp.float32),
            in_specs=in_specs,
            out_specs=pl.BlockSpec((Bt, self.Xp), lambda i: (i, 0)),
            compiler_params=pltpu.CompilerParams(
                dimension_semantics=("parallel",),   # shard batch on v7x 2 TCs
                vmem_limit_bytes=vmem_limit),
            cost_estimate=cost,
        )(x_pad, *params)

        # Slice padded rows / lanes back to the logical output shape.
        return out[:B, : self.x_dim]

    def _get_fwd(self, buffered):
        if buffered not in self._fwd_cache:
            self._fwd_cache[buffered] = jax.jit(
                functools.partial(self._forward_impl, buffered=buffered))
        return self._fwd_cache[buffered]

    def __call__(self, z, c=None):
        args = (z, c) if self.conditional else (z,)
        if self._use_buffered is None:
            try:
                out = jax.block_until_ready(
                    self._get_fwd(True)(self.flat_params, *args))
                self._use_buffered = True
                return out
            except Exception:
                # pipeline_mode=pl.Buffered(1) not supported on this jax/libtpu:
                # fall back to default (double-buffered) weight specs.
                self._use_buffered = False
        return self._get_fwd(self._use_buffered)(self.flat_params, *args)

    # Pure-JAX reference mirroring the kernel math (bf16-rounded weights and
    # activations, f32 accumulation) for correctness checking.
    def reference(self, z, c=None):
        h = jnp.concatenate((z, c), axis=1) if self.conditional else z
        h = h.astype(jnp.bfloat16).astype(jnp.float32)
        for W, b in self._ref_params[:-1]:
            h = jnp.maximum(h @ W + b, 0.0)
            h = h.astype(jnp.bfloat16).astype(jnp.float32)
        W, b = self._ref_params[-1]
        return h @ W + b


if __name__ == "__main__":
    # Small config consistent with GenomicModelConfig usage.
    z_dim, c_embedded, decoder_dims, x_dim = 16, 8, [32, 64], 48
    batch = 4

    dec = DecoderPallas(z_dim=z_dim, c_embedded=c_embedded,
                        decoder_dims=decoder_dims, x_dim=x_dim,
                        conditional=True, key=jax.random.PRNGKey(0))

    kz, kc = jax.random.split(jax.random.PRNGKey(0))
    z = jax.random.normal(kz, (batch, z_dim), jnp.float32)
    c = jax.random.normal(kc, (batch, c_embedded), jnp.float32)

    out = jax.block_until_ready(dec(z, c))
    assert out.shape == (batch, x_dim)

    ref = jax.block_until_ready(dec.reference(z, c))
    # Kernel: bf16 operands, f32 MXU accumulation. Reference: identical bf16
    # rounding with f32 math -> only accumulation-order differences remain.
    np.testing.assert_allclose(np.asarray(out), np.asarray(ref),
                               rtol=1e-2, atol=1e-2)

    print("KERNEL_OK")
</pallas_src>

<mosaic_0001>
module attributes {stable_mosaic.version = 11 : i64} {
  func.func @_fused_mlp_kernel(%arg0: i32, %arg1: memref<16x128xbf16, #tpu.memory_space<vmem>>, %arg2: memref<128x128xbf16, #tpu.memory_space<vmem>>, %arg3: memref<1x128xf32, #tpu.memory_space<vmem>>, %arg4: memref<128x128xbf16, #tpu.memory_space<vmem>>, %arg5: memref<1x128xf32, #tpu.memory_space<vmem>>, %arg6: memref<128x128xbf16, #tpu.memory_space<vmem>>, %arg7: memref<1x128xf32, #tpu.memory_space<vmem>>, %arg8: memref<16x128xf32, #tpu.memory_space<vmem>>) attributes {dimension_semantics = [#tpu.dimension_semantics<parallel>], iteration_bounds = array<i64: 1>, scalar_prefetch = 0 : i64, scratch_operands = 0 : i64, tpu.core_type = #tpu.core_type<tc>, window_params = [{transform_indices = @transform_0, window_bounds = array<i64: 16, 128>}, {pipeline_mode = #tpu.pipeline_mode<synchronous>, transform_indices = @transform_1, window_bounds = array<i64: 128, 128>}, {pipeline_mode = #tpu.pipeline_mode<synchronous>, transform_indices = @transform_2, window_bounds = array<i64: 1, 128>}, {pipeline_mode = #tpu.pipeline_mode<synchronous>, transform_indices = @transform_3, window_bounds = array<i64: 128, 128>}, {pipeline_mode = #tpu.pipeline_mode<synchronous>, transform_indices = @transform_4, window_bounds = array<i64: 1, 128>}, {pipeline_mode = #tpu.pipeline_mode<synchronous>, transform_indices = @transform_5, window_bounds = array<i64: 128, 128>}, {pipeline_mode = #tpu.pipeline_mode<synchronous>, transform_indices = @transform_6, window_bounds = array<i64: 1, 128>}, {transform_indices = @transform_7, window_bounds = array<i64: 16, 128>}]} {
    %c0 = arith.constant 0 : index
    %c0_0 = arith.constant 0 : index
    %0 = vector.load %arg1[%c0, %c0_0] : memref<16x128xbf16, #tpu.memory_space<vmem>>, vector<16x128xbf16>
    %c0_1 = arith.constant 0 : index
    %c0_2 = arith.constant 0 : index
    %1 = vector.load %arg2[%c0_1, %c0_2] : memref<128x128xbf16, #tpu.memory_space<vmem>>, vector<128x128xbf16>
    %cst = arith.constant dense<0.000000e+00> : vector<16x128xf32>
    %2 = tpu.matmul %0, %1, %cst {dimension_numbers = #tpu.dot_dimension_numbers<[1], [0], [0], [1], [0, 0, 1, 1], [], []>} : vector<16x128xbf16>, vector<128x128xbf16>, vector<16x128xf32> -> vector<16x128xf32>
    %c0_3 = arith.constant 0 : index
    %c0_4 = arith.constant 0 : index
    %3 = vector.load %arg3[%c0_3, %c0_4] : memref<1x128xf32, #tpu.memory_space<vmem>>, vector<1x128xf32>
    %4 = vector.broadcast %3 : vector<1x128xf32> to vector<16x128xf32>
    %5 = arith.addf %2, %4 : vector<16x128xf32>
    %cst_5 = arith.constant 0.000000e+00 : f32
    %6 = vector.broadcast %cst_5 : f32 to vector<16x128xf32>
    %7 = arith.maximumf %5, %6 : vector<16x128xf32>
    %8 = arith.truncf %7 : vector<16x128xf32> to vector<16x128xbf16>
    %c0_6 = arith.constant 0 : index
    %c0_7 = arith.constant 0 : index
    %9 = vector.load %arg4[%c0_6, %c0_7] : memref<128x128xbf16, #tpu.memory_space<vmem>>, vector<128x128xbf16>
    %cst_8 = arith.constant dense<0.000000e+00> : vector<16x128xf32>
    %10 = tpu.matmul %8, %9, %cst_8 {dimension_numbers = #tpu.dot_dimension_numbers<[1], [0], [0], [1], [0, 0, 1, 1], [], []>} : vector<16x128xbf16>, vector<128x128xbf16>, vector<16x128xf32> -> vector<16x128xf32>
    %c0_9 = arith.constant 0 : index
    %c0_10 = arith.constant 0 : index
    %11 = vector.load %arg5[%c0_9, %c0_10] : memref<1x128xf32, #tpu.memory_space<vmem>>, vector<1x128xf32>
    %12 = vector.broadcast %11 : vector<1x128xf32> to vector<16x128xf32>
    %13 = arith.addf %10, %12 : vector<16x128xf32>
    %cst_11 = arith.constant 0.000000e+00 : f32
    %14 = vector.broadcast %cst_11 : f32 to vector<16x128xf32>
    %15 = arith.maximumf %13, %14 : vector<16x128xf32>
    %16 = arith.truncf %15 : vector<16x128xf32> to vector<16x128xbf16>
    %c0_12 = arith.constant 0 : index
    %c0_13 = arith.constant 0 : index
    %17 = vector.load %arg6[%c0_12, %c0_13] : memref<128x128xbf16, #tpu.memory_space<vmem>>, vector<128x128xbf16>
    %cst_14 = arith.constant dense<0.000000e+00> : vector<16x128xf32>
    %18 = tpu.matmul %16, %17, %cst_14 {dimension_numbers = #tpu.dot_dimension_numbers<[1], [0], [0], [1], [0, 0, 1, 1], [], []>} : vector<16x128xbf16>, vector<128x128xbf16>, vector<16x128xf32> -> vector<16x128xf32>
    %c0_15 = arith.constant 0 : index
    %c0_16 = arith.constant 0 : index
    %19 = vector.load %arg7[%c0_15, %c0_16] : memref<1x128xf32, #tpu.memory_space<vmem>>, vector<1x128xf32>
    %20 = vector.broadcast %19 : vector<1x128xf32> to vector<16x128xf32>
    %21 = arith.addf %18, %20 : vector<16x128xf32>
    %c0_17 = arith.constant 0 : index
    %c0_18 = arith.constant 0 : index
    %22 = vector.load %arg8[%c0_17, %c0_18] : memref<16x128xf32, #tpu.memory_space<vmem>>, vector<16x128xf32>
    tpu.vector_store %arg8[%c0_17, %c0_18], %21 {strides = array<i32>} : memref<16x128xf32, #tpu.memory_space<vmem>>, vector<16x128xf32>,
    return
  }
  func.func @transform_0(%arg0: i32) -> (i32, i32) {
    %c0_i32 = arith.constant 0 : i32
    %c0_i32_0 = arith.constant 0 : i32
    return %arg0, %c0_i32 : i32, i32
  }
  func.func @transform_1(%arg0: i32) -> (i32, i32) {
    %c0_i32 = arith.constant 0 : i32
    %c0_i32_0 = arith.constant 0 : i32
    %c0_i32_1 = arith.constant 0 : i32
    return %c0_i32, %c0_i32_0 : i32, i32
  }
  func.func @transform_2(%arg0: i32) -> (i32, i32) {
    %c0_i32 = arith.constant 0 : i32
    %c0_i32_0 = arith.constant 0 : i32
    %c0_i32_1 = arith.constant 0 : i32
    return %c0_i32, %c0_i32_0 : i32, i32
  }
  func.func @transform_3(%arg0: i32) -> (i32, i32) {
    %c0_i32 = arith.constant 0 : i32
    %c0_i32_0 = arith.constant 0 : i32
    %c0_i32_1 = arith.constant 0 : i32
    return %c0_i32, %c0_i32_0 : i32, i32
  }
  func.func @transform_4(%arg0: i32) -> (i32, i32) {
    %c0_i32 = arith.constant 0 : i32
    %c0_i32_0 = arith.constant 0 : i32
    %c0_i32_1 = arith.constant 0 : i32
    return %c0_i32, %c0_i32_0 : i32, i32
  }
  func.func @transform_5(%arg0: i32) -> (i32, i32) {
    %c0_i32 = arith.constant 0 : i32
    %c0_i32_0 = arith.constant 0 : i32
    %c0_i32_1 = arith.constant 0 : i32
    return %c0_i32, %c0_i32_0 : i32, i32
  }
  func.func @transform_6(%arg0: i32) -> (i32, i32) {
    %c0_i32 = arith.constant 0 : i32
    %c0_i32_0 = arith.constant 0 : i32
    %c0_i32_1 = arith.constant 0 : i32
    return %c0_i32, %c0_i32_0 : i32, i32
  }
  func.func @transform_7(%arg0: i32) -> (i32, i32) {
    %c0_i32 = arith.constant 0 : i32
    %c0_i32_0 = arith.constant 0 : i32
    return %arg0, %c0_i32 : i32, i32
  }
}

module attributes {stable_mosaic.version = 11 : i64} {
  func.func @_fused_mlp_kernel(%arg0: i32, %arg1: memref<16x128xbf16, #tpu.memory_space<vmem>>, %arg2: memref<128x128xbf16, #tpu.memory_space<vmem>>, %arg3: memref<1x128xf32, #tpu.memory_space<vmem>>, %arg4: memref<128x128xbf16, #tpu.memory_space<vmem>>, %arg5: memref<1x128xf32, #tpu.memory_space<vmem>>, %arg6: memref<128x128xbf16, #tpu.memory_space<vmem>>, %arg7: memref<1x128xf32, #tpu.memory_space<vmem>>, %arg8: memref<16x128xf32, #tpu.memory_space<vmem>>) attributes {dimension_semantics = [#tpu.dimension_semantics<parallel>], iteration_bounds = array<i64: 1>, scalar_prefetch = 0 : i64, scratch_operands = 0 : i64, tpu.core_type = #tpu.core_type<tc>, window_params = [{transform_indices = @transform_0, window_bounds = array<i64: 16, 128>}, {pipeline_mode = #tpu.pipeline_mode<synchronous>, transform_indices = @transform_1, window_bounds = array<i64: 128, 128>}, {pipeline_mode = #tpu.pipeline_mode<synchronous>, transform_indices = @transform_2, window_bounds = array<i64: 1, 128>}, {pipeline_mode = #tpu.pipeline_mode<synchronous>, transform_indices = @transform_3, window_bounds = array<i64: 128, 128>}, {pipeline_mode = #tpu.pipeline_mode<synchronous>, transform_indices = @transform_4, window_bounds = array<i64: 1, 128>}, {pipeline_mode = #tpu.pipeline_mode<synchronous>, transform_indices = @transform_5, window_bounds = array<i64: 128, 128>}, {pipeline_mode = #tpu.pipeline_mode<synchronous>, transform_indices = @transform_6, window_bounds = array<i64: 1, 128>}, {transform_indices = @transform_7, window_bounds = array<i64: 16, 128>}]} {
    %c0 = arith.constant 0 : index
    %c0_0 = arith.constant 0 : index
    %0 = vector.load %arg1[%c0, %c0_0] : memref<16x128xbf16, #tpu.memory_space<vmem>>, vector<16x128xbf16>
    %c0_1 = arith.constant 0 : index
    %c0_2 = arith.constant 0 : index
    %1 = vector.load %arg2[%c0_1, %c0_2] : memref<128x128xbf16, #tpu.memory_space<vmem>>, vector<128x128xbf16>
    %cst = arith.constant dense<0.000000e+00> : vector<16x128xf32>
    %2 = tpu.matmul %0, %1, %cst {dimension_numbers = #tpu.dot_dimension_numbers<[1], [0], [0], [1], [0, 0, 1, 1], [], []>} : vector<16x128xbf16>, vector<128x128xbf16>, vector<16x128xf32> -> vector<16x128xf32>
    %c0_3 = arith.constant 0 : index
    %c0_4 = arith.constant 0 : index
    %3 = vector.load %arg3[%c0_3, %c0_4] : memref<1x128xf32, #tpu.memory_space<vmem>>, vector<1x128xf32>
    %4 = vector.broadcast %3 : vector<1x128xf32> to vector<16x128xf32>
    %5 = arith.addf %2, %4 : vector<16x128xf32>
    %cst_5 = arith.constant 0.000000e+00 : f32
    %6 = vector.broadcast %cst_5 : f32 to vector<16x128xf32>
    %7 = arith.maximumf %5, %6 : vector<16x128xf32>
    %8 = arith.truncf %7 : vector<16x128xf32> to vector<16x128xbf16>
    %c0_6 = arith.constant 0 : index
    %c0_7 = arith.constant 0 : index
    %9 = vector.load %arg4[%c0_6, %c0_7] : memref<128x128xbf16, #tpu.memory_space<vmem>>, vector<128x128xbf16>
    %cst_8 = arith.constant dense<0.000000e+00> : vector<16x128xf32>
    %10 = tpu.matmul %8, %9, %cst_8 {dimension_numbers = #tpu.dot_dimension_numbers<[1], [0], [0], [1], [0, 0, 1, 1], [], []>} : vector<16x128xbf16>, vector<128x128xbf16>, vector<16x128xf32> -> vector<16x128xf32>
    %c0_9 = arith.constant 0 : index
    %c0_10 = arith.constant 0 : index
    %11 = vector.load %arg5[%c0_9, %c0_10] : memref<1x128xf32, #tpu.memory_space<vmem>>, vector<1x128xf32>
    %12 = vector.broadcast %11 : vector<1x128xf32> to vector<16x128xf32>
    %13 = arith.addf %10, %12 : vector<16x128xf32>
    %cst_11 = arith.constant 0.000000e+00 : f32
    %14 = vector.broadcast %cst_11 : f32 to vector<16x128xf32>
    %15 = arith.maximumf %13, %14 : vector<16x128xf32>
    %16 = arith.truncf %15 : vector<16x128xf32> to vector<16x128xbf16>
    %c0_12 = arith.constant 0 : index
    %c0_13 = arith.constant 0 : index
    %17 = vector.load %arg6[%c0_12, %c0_13] : memref<128x128xbf16, #tpu.memory_space<vmem>>, vector<128x128xbf16>
    %cst_14 = arith.constant dense<0.000000e+00> : vector<16x128xf32>
    %18 = tpu.matmul %16, %17, %cst_14 {dimension_numbers = #tpu.dot_dimension_numbers<[1], [0], [0], [1], [0, 0, 1, 1], [], []>} : vector<16x128xbf16>, vector<128x128xbf16>, vector<16x128xf32> -> vector<16x128xf32>
    %c0_15 = arith.constant 0 : index
    %c0_16 = arith.constant 0 : index
    %19 = vector.load %arg7[%c0_15, %c0_16] : memref<1x128xf32, #tpu.memory_space<vmem>>, vector<1x128xf32>
    %20 = vector.broadcast %19 : vector<1x128xf32> to vector<16x128xf32>
    %21 = arith.addf %18, %20 : vector<16x128xf32>
    %c0_17 = arith.constant 0 : index
    %c0_18 = arith.constant 0 : index
    %22 = vector.load %arg8[%c0_17, %c0_18] : memref<16x128xf32, #tpu.memory_space<vmem>>, vector<16x128xf32>
    tpu.vector_store %arg8[%c0_17, %c0_18], %21 {strides = array<i32>} : memref<16x128xf32, #tpu.memory_space<vmem>>, vector<16x128xf32>,
    return
  }
  func.func @transform_0(%arg0: i32) -> (i32, i32) {
    %c0_i32 = arith.constant 0 : i32
    %c0_i32_0 = arith.constant 0 : i32
    return %arg0, %c0_i32 : i32, i32
  }
  func.func @transform_1(%arg0: i32) -> (i32, i32) {
    %c0_i32 = arith.constant 0 : i32
    %c0_i32_0 = arith.constant 0 : i32
    %c0_i32_1 = arith.constant 0 : i32
    return %c0_i32, %c0_i32_0 : i32, i32
  }
  func.func @transform_2(%arg0: i32) -> (i32, i32) {
    %c0_i32 = arith.constant 0 : i32
    %c0_i32_0 = arith.constant 0 : i32
    %c0_i32_1 = arith.constant 0 : i32
    return %c0_i32, %c0_i32_0 : i32, i32
  }
  func.func @transform_3(%arg0: i32) -> (i32, i32) {
    %c0_i32 = arith.constant 0 : i32
    %c0_i32_0 = arith.constant 0 : i32
    %c0_i32_1 = arith.constant 0 : i32
    return %c0_i32, %c0_i32_0 : i32, i32
  }
  func.func @transform_4(%arg0: i32) -> (i32, i32) {
    %c0_i32 = arith.constant 0 : i32
    %c0_i32_0 = arith.constant 0 : i32
    %c0_i32_1 = arith.constant 0 : i32
    return %c0_i32, %c0_i32_0 : i32, i32
  }
  func.func @transform_5(%arg0: i32) -> (i32, i32) {
    %c0_i32 = arith.constant 0 : i32
    %c0_i32_0 = arith.constant 0 : i32
    %c0_i32_1 = arith.constant 0 : i32
    return %c0_i32, %c0_i32_0 : i32, i32
  }
  func.func @transform_6(%arg0: i32) -> (i32, i32) {
    %c0_i32 = arith.constant 0 : i32
    %c0_i32_0 = arith.constant 0 : i32
    %c0_i32_1 = arith.constant 0 : i32
    return %c0_i32, %c0_i32_0 : i32, i32
  }
  func.func @transform_7(%arg0: i32) -> (i32, i32) {
    %c0_i32 = arith.constant 0 : i32
    %c0_i32_0 = arith.constant 0 : i32
    return %arg0, %c0_i32 : i32, i32
  }
}

</mosaic_0001>

<bundles_post_ra>
// kernel: _forward_impl.1
= control target key start
LH: loop header
LB: loop body
LE: loop exit
PB: predicated region body
PF: predicated region fallthrough
CT: control target
= control target key end

     0   :  { %12 = vsyncpa [#allocation3], 0  ;;  %s790_s0 = inlined_call_operand.vmem [shape: bf16[16,128], index: 0, kind: input, shape index: {}]   ;;  %s791_s1 = inlined_call_operand.hbm [shape: bf16[128,128], index: 1, kind: input, shape index: {}]   ;;  %s792_s2 = inlined_call_operand.vmem [shape: f32[1,128], index: 2, kind: input, shape index: {}]   ;;  %s793_s3 = inlined_call_operand.hbm [shape: bf16[128,128], index: 3, kind: input, shape index: {}]   ;;  %s794_s4 = inlined_call_operand.vmem [shape: f32[1,128], index: 4, kind: input, shape index: {}]   ;;  %s795_s5 = inlined_call_operand.hbm [shape: bf16[128,128], index: 5, kind: input, shape index: {}]   ;;  %s796_s6 = inlined_call_operand.vmem [shape: f32[1,128], index: 6, kind: input, shape index: {}]   ;;  %s797_s7 = inlined_call_operand.vmem [shape: f32[16,128], index: 7, kind: output, shape index: {}]  }
   0x1   :  { %13 = vsyncpa [#allocation5], 0  ;;  %s643_s24 = smov [#allocation4]   ;;  %s644_s26 = smov [#allocation2]  }
   0x2   :  { %s35_s25 = sshll.u32 %s643_s24, 4  ;;  %s21_s27 = sshll.u32 %s644_s26, 4  ;;  %s36_s25 = int_to_ptr.vmem [resolvable:$true] %s35_s25  ;;  %s690_s27 = int_to_ptr.vmem [resolvable:$true] %s21_s27 }
   0x3   :  { %s573_s30 = scalar_lea.hbm %s793_s3, 1024 }
   0x4   :  { %p574_p0 = scmp.ne.s32.totalorder %s793_s3, %s573_s30  ;;  %p577_p1 = scmp.lt.u32.totalorder %s573_s30, %s793_s3 }
   0x6   :  { %p579_p2 = pnand %p577_p1, %p574_p0 }
   0x8   :  { %582 = shalt.err (!%p579_p2)
}
   0x9   :  { %s583_s12 = scalar_lea.vmem %s36_s25, 1024  ;;  %p588_p4 = scmp.lt.s32.totalorder %s36_s25, %s36_s25 }
   0xa   :  { %p584_p3 = scmp.ne.s32.totalorder %s36_s25, %s583_s12  ;;  %p589_p5 = scmp.lt.s32.totalorder %s583_s12, %s583_s12 }
   0xc   :  { %p590_p6 = por %p589_p5, %p588_p4 }
   0xe   :  { %p591_p7 = pnand %p590_p6, %p584_p3 }
  0x10   :  { %594 = shalt.err (!%p591_p7)
}
  0x11   :  { %s645_s13 = smov 64   ;;  %s646_s14 = smov 4  }
  0x12   :  { %41 = dma.hbm_to_vmem [thread:$0]  %s793_s3, 1024, %s36_s25, [#allocation5], %s645_s13, %s645_s13, %s646_s14  }
  0x13   :  { %s595_s19 = scalar_lea.hbm %s791_s1, 1024 }
  0x14   :  { %p596_p8 = scmp.ne.s32.totalorder %s791_s1, %s595_s19  ;;  %p599_p9 = scmp.lt.u32.totalorder %s595_s19, %s791_s1 }
  0x16   :  { %p601_p10 = pnand %p599_p9, %p596_p8 }
  0x18   :  { %604 = shalt.err (!%p601_p10)
}
  0x19   :  { %s605_s24 = scalar_lea.vmem %s690_s27, 1024  ;;  %p610_p12 = scmp.lt.s32.totalorder %s690_s27, %s690_s27 }
  0x1a   :  { %p606_p11 = scmp.ne.s32.totalorder %s690_s27, %s605_s24  ;;  %p611_p13 = scmp.lt.s32.totalorder %s605_s24, %s605_s24 }
  0x1c   :  { %p612_p0 = por %p611_p13, %p610_p12 }
  0x1e   :  { %p613_p1 = pnand %p612_p0, %p606_p11 }
  0x20   :  { %616 = shalt.err (!%p613_p1)
}
  0x21   :  { %27 = dma.hbm_to_vmem [thread:$0]  %s791_s1, 1024, %s690_s27, [#allocation3], %s645_s13, %s645_s13, %s646_s14  }
  0x22   :  { %s647_s26 = smov [#allocation6]   ;;  %s617_s8 = scalar_lea.hbm %s795_s5, 1024 }
  0x23   :  { %s49_s28 = sshll.u32 %s647_s26, 4  ;;  %p618_p2 = scmp.ne.s32.totalorder %s795_s5, %s617_s8  ;;  %s50_s28 = int_to_ptr.vmem [resolvable:$true] %s49_s28 }
  0x24   :  { %p621_p3 = scmp.lt.u32.totalorder %s617_s8, %s795_s5 }
  0x26   :  { %p623_p4 = pnand %p621_p3, %p618_p2 }
  0x28   :  { %626 = shalt.err (!%p623_p4)
}
  0x29   :  { %s627_s15 = scalar_lea.vmem %s50_s28, 1024  ;;  %p632_p6 = scmp.lt.s32.totalorder %s50_s28, %s50_s28 }
  0x2a   :  { %p628_p5 = scmp.ne.s32.totalorder %s50_s28, %s627_s15  ;;  %p633_p7 = scmp.lt.s32.totalorder %s627_s15, %s627_s15 }
  0x2c   :  { %p634_p8 = por %p633_p7, %p632_p6 }
  0x2e   :  { %p635_p9 = pnand %p634_p8, %p628_p5 }
  0x30   :  { %638 = shalt.err (!%p635_p9)
}
  0x31   :  { %55 = dma.hbm_to_vmem [thread:$0]  %s795_s5, 1024, %s50_s28, [#allocation5], %s645_s13, %s645_s13, %s646_s14  }
  0x32   :  { %639 = dma.done.wait [#allocation3], 1024  }
  0x33   :  { %640 = vsyncadd [#allocation3], 4294966272 }
  0x34   :  { %641 = dma.done.wait [#allocation5], 2048  }
  0x35   :  { %642 = vsyncadd [#allocation5], 4294965248  ;;  %v648_v0 = vmov 0.0   ;;  %vm649_vm0 = vmmov 0   ;;  %v548_v1 = vld [vmem:[#allocation2] sm:$0xff]   ;;  %v549_v2 = vld [vmem:[#allocation2 + $0x8] sm:$0xff]  }
  0x36   :  { %481 = vmatprep.subr.bf16.mxu0 %v648_v0  ;;  %497 = vmatprep.mubr.msk.bf16.mxu0 %vm649_vm0, %v648_v0  ;;  %v550_v3 = vld [vmem:[#allocation2 + $0x10] sm:$0xff]   ;;  %v557_v4 = vld [vmem:[#allocation4] sm:$0xff]   ;;  %v551_v5 = vld [vmem:[#allocation2 + $0x18] sm:$0xff]  }
  0x37   :  { %501 = vmatprep.subr.bf16.mxu1 %v648_v0  ;;  %517 = vmatprep.mubr.msk.bf16.mxu1 %vm649_vm0, %v648_v0  ;;  %v558_v6 = vld [vmem:[#allocation4 + $0x8] sm:$0xff]   ;;  %v552_v7 = vld [vmem:[#allocation2 + $0x20] sm:$0xff]   ;;  %v559_v8 = vld [vmem:[#allocation4 + $0x10] sm:$0xff]  }
  0x38   :  { %482 = vmatpush3.bf16.msra.mxu0 %v548_v1  ;;  %502 = vmatpush3.bf16.msra.mxu1 %v557_v4  ;;  %v553_v9 = vld [vmem:[#allocation2 + $0x28] sm:$0xff]   ;;  %v560_v10 = vld [vmem:[#allocation4 + $0x18] sm:$0xff]   ;;  %v554_v11 = vld [vmem:[#allocation2 + $0x30] sm:$0xff]  }
  0x39   :  { %483 = vmatprep.subr.bf16.mxu0 %v648_v0  ;;  %503 = vmatprep.subr.bf16.mxu1 %v648_v0  ;;  %v561_v12 = vld [vmem:[#allocation4 + $0x20] sm:$0xff]   ;;  %v555_v13 = vld [vmem:[#allocation2 + $0x38] sm:$0xff]   ;;  %v562_v14 = vld [vmem:[#allocation4 + $0x28] sm:$0xff]  }
  0x3a   :  { %v556_v15 = vld [vmem:[%s790_s0] sm:$0xff]   ;;  %v563_v16 = vld [vmem:[#allocation4 + $0x30] sm:$0xff]   ;;  %v564_v17 = vld [vmem:[#allocation4 + $0x38] sm:$0xff]  }
  0x3b   :  { %v565_v18 = vld [vmem:[#allocation6] sm:$0xff]   ;;  %v566_v19 = vld [vmem:[#allocation6 + $0x8] sm:$0xff]   ;;  %v567_v20 = vld [vmem:[#allocation6 + $0x10] sm:$0xff]  }
  0x3c   :  { %484 = vmatpush3.bf16.msra.mxu0 %v549_v2  ;;  %504 = vmatpush3.bf16.msra.mxu1 %v558_v6  ;;  %v568_v21 = vld [vmem:[#allocation6 + $0x18] sm:$0xff]   ;;  %v569_v22 = vld [vmem:[#allocation6 + $0x20] sm:$0xff]   ;;  %v570_v23 = vld [vmem:[#allocation6 + $0x28] sm:$0xff]  }
  0x3d   :  { %485 = vmatprep.subr.bf16.mxu0 %v648_v0  ;;  %505 = vmatprep.subr.bf16.mxu1 %v648_v0  ;;  %v426_v24 = vld [vmem:[%s792_s2] ss:$0 sm:$0xff]  ;;  %v571_v34 = vld [vmem:[#allocation6 + $0x30] sm:$0xff]   ;;  %v572_v35 = vld [vmem:[#allocation6 + $0x38] sm:$0xff]  }
  0x3e   :  { %v436_v36 = vld [vmem:[%s794_s4] ss:$0 sm:$0xff] }
  0x3f   :  { %v445_v46 = vld [vmem:[%s796_s6] ss:$0 sm:$0xff] }
  0x40   :  { %486 = vmatpush3.bf16.msra.mxu0 %v550_v3  ;;  %506 = vmatpush3.bf16.msra.mxu1 %v559_v8 }
  0x41   :  { %487 = vmatprep.subr.bf16.mxu0 %v648_v0  ;;  %507 = vmatprep.subr.bf16.mxu1 %v648_v0 }
  0x44   :  { %488 = vmatpush3.bf16.msra.mxu0 %v551_v5  ;;  %508 = vmatpush3.bf16.msra.mxu1 %v560_v10 }
  0x45   :  { %489 = vmatprep.subr.bf16.mxu0 %v648_v0  ;;  %509 = vmatprep.subr.bf16.mxu1 %v648_v0 }
  0x48   :  { %490 = vmatpush3.bf16.msra.mxu0 %v552_v7  ;;  %510 = vmatpush3.bf16.msra.mxu1 %v561_v12 }
  0x49   :  { %491 = vmatprep.subr.bf16.mxu0 %v648_v0  ;;  %511 = vmatprep.subr.bf16.mxu1 %v648_v0 }
  0x4c   :  { %492 = vmatpush3.bf16.msra.mxu0 %v553_v9  ;;  %512 = vmatpush3.bf16.msra.mxu1 %v562_v14 }
  0x4d   :  { %493 = vmatprep.subr.bf16.mxu0 %v648_v0  ;;  %513 = vmatprep.subr.bf16.mxu1 %v648_v0 }
  0x50   :  { %494 = vmatpush3.bf16.msra.mxu0 %v554_v11  ;;  %514 = vmatpush3.bf16.msra.mxu1 %v563_v16 }
  0x51   :  { %495 = vmatprep.subr.bf16.mxu0 %v648_v0  ;;  %515 = vmatprep.subr.bf16.mxu1 %v648_v0 }
  0x54   :  { %496 = vmatpush3.bf16.msra.mxu0 %v555_v13  ;;  %516 = vmatpush3.bf16.msra.mxu1 %v564_v17 }
  0x55   :  { %521 = vmatprep.subr.bf16.mxu0 %v648_v0 }
  0x57   :  { %498 = vmatmul.mubr.bf16.vlgmr.msra.gmra.mrb[0].mxu0 %v556_v15 }
  0x58   :  { %537 = vmatprep.mubr.msk.bf16.mxu0 %vm649_vm0, %v648_v0  ;;  %522 = vmatpush3.bf16.msra.mxu0 %v565_v18 }
  0x59   :  { %523 = vmatprep.subr.bf16.mxu0 %v648_v0 }
  0x5c   :  { %524 = vmatpush3.bf16.msra.mxu0 %v566_v19 }
  0x5d   :  { %525 = vmatprep.subr.bf16.mxu0 %v648_v0 }
  0x60   :  { %526 = vmatpush3.bf16.msra.mxu0 %v567_v20 }
  0x61   :  { %527 = vmatprep.subr.bf16.mxu0 %v648_v0 }
  0x64   :  { %528 = vmatpush3.bf16.msra.mxu0 %v568_v21 }
  0x65   :  { %529 = vmatprep.subr.bf16.mxu0 %v648_v0 }
  0x68   :  { %530 = vmatpush3.bf16.msra.mxu0 %v569_v22 }
  0x69   :  { %531 = vmatprep.subr.bf16.mxu0 %v648_v0 }
  0x6c   :  { %532 = vmatpush3.bf16.msra.mxu0 %v570_v23 }
  0x6d   :  { %533 = vmatprep.subr.bf16.mxu0 %v648_v0 }
  0x70   :  { %534 = vmatpush3.bf16.msra.mxu0 %v571_v34 }
  0x71   :  { %535 = vmatprep.subr.bf16.mxu0 %v648_v0 }
  0x74   :  { %536 = vmatpush3.bf16.msra.mxu0 %v572_v35 }
 0x12a   :  { %v181_v25 = vpop.f32.mrb[0].mxu0 }
 0x12b   :  { %v182_v26 = vadd.f32 %v426_v24, %v181_v25  ;;  %v499_v27 = vpop.f32.mrb[1].mxu0 }
 0x12c   :  { %v184_v28 = vpop.f32.mrb[2].mxu0 }
 0x12d   :  { %v185_v29 = vadd.f32 %v426_v24, %v184_v28  ;;  %v500_v30 = vpop.f32.mrb[3].mxu0  ;;  %v188_v31 = vmax.f32 %v182_v26, 0.0 }
 0x12f   :  { %v189_v32 = vmax.f32 %v185_v29, 0.0 }
 0x131   :  { %v190_v33 = vpack.c.bf16 %v189_v32, %v188_v31 }
 0x133   :  { %518 = vmatmul.mubr.bf16.vlgmr.msra.gmra.mrb[0].mxu1 %v190_v33 }
 0x206   :  { %v296_v37 = vpop.f32.mrb[0].mxu1 }
 0x207   :  { %v297_v38 = vadd.f32 %v436_v36, %v296_v37  ;;  %v519_v39 = vpop.f32.mrb[1].mxu1 }
 0x208   :  { %v299_v40 = vpop.f32.mrb[2].mxu1 }
 0x209   :  { %v300_v41 = vadd.f32 %v436_v36, %v299_v40  ;;  %v520_v42 = vpop.f32.mrb[3].mxu1  ;;  %v303_v43 = vmax.f32 %v297_v38, 0.0 }
 0x20b   :  { %v304_v44 = vmax.f32 %v300_v41, 0.0 }
 0x20d   :  { %v305_v45 = vpack.c.bf16 %v304_v44, %v303_v43 }
 0x20f   :  { %538 = vmatmul.mubr.bf16.vlgmr.msra.gmra.mrb[4].mxu0 %v305_v45 }
 0x2e2   :  { %v411_v47 = vpop.f32.mrb[4].mxu0 }
 0x2e3   :  { %v412_v48 = vadd.f32 %v445_v46, %v411_v47  ;;  %v539_v49 = vpop.f32.mrb[5].mxu0 }
 0x2e4   :  { %v414_v50 = vpop.f32.mrb[6].mxu0 }
 0x2e5   :  { %418 = vst [vmem:[%s797_s7] sm:$0xff] %v412_v48  ;;  %v415_v51 = vadd.f32 %v445_v46, %v414_v50  ;;  %v540_v52 = vpop.f32.mrb[7].mxu0 }
 0x2e7   :  { %419 = vst [vmem:[%s797_s7 + $0x8] sm:$0xff] %v415_v51 }
 0x2e8   :  { %424 = vsyncpa [#allocation3], 1 }
 0x2e9   :  { %425 = vsyncpa [#allocation5], 1 }

// kernel: _forward_impl.1
= control target key start
LH: loop header
LB: loop body
LE: loop exit
PB: predicated region body
PF: predicated region fallthrough
CT: control target
= control target key end

     0   :  { %12 = vsyncpa [#allocation3], 0  ;;  %s790_s0 = inlined_call_operand.vmem [shape: bf16[16,128], index: 0, kind: input, shape index: {}]   ;;  %s791_s1 = inlined_call_operand.hbm [shape: bf16[128,128], index: 1, kind: input, shape index: {}]   ;;  %s792_s2 = inlined_call_operand.vmem [shape: f32[1,128], index: 2, kind: input, shape index: {}]   ;;  %s793_s3 = inlined_call_operand.hbm [shape: bf16[128,128], index: 3, kind: input, shape index: {}]   ;;  %s794_s4 = inlined_call_operand.vmem [shape: f32[1,128], index: 4, kind: input, shape index: {}]   ;;  %s795_s5 = inlined_call_operand.hbm [shape: bf16[128,128], index: 5, kind: input, shape index: {}]   ;;  %s796_s6 = inlined_call_operand.vmem [shape: f32[1,128], index: 6, kind: input, shape index: {}]   ;;  %s797_s7 = inlined_call_operand.vmem [shape: f32[16,128], index: 7, kind: output, shape index: {}]  }
   0x1   :  { %13 = vsyncpa [#allocation5], 0  ;;  %s643_s24 = smov [#allocation4]   ;;  %s644_s26 = smov [#allocation2]  }
   0x2   :  { %s35_s25 = sshll.u32 %s643_s24, 4  ;;  %s21_s27 = sshll.u32 %s644_s26, 4  ;;  %s36_s25 = int_to_ptr.vmem [resolvable:$true] %s35_s25  ;;  %s690_s27 = int_to_ptr.vmem [resolvable:$true] %s21_s27 }
   0x3   :  { %s573_s30 = scalar_lea.hbm %s793_s3, 1024 }
   0x4   :  { %p574_p0 = scmp.ne.s32.totalorder %s793_s3, %s573_s30  ;;  %p577_p1 = scmp.lt.u32.totalorder %s573_s30, %s793_s3 }
   0x6   :  { %p579_p2 = pnand %p577_p1, %p574_p0 }
   0x8   :  { %582 = shalt.err (!%p579_p2)
}
   0x9   :  { %s583_s12 = scalar_lea.vmem %s36_s25, 1024  ;;  %p588_p4 = scmp.lt.s32.totalorder %s36_s25, %s36_s25 }
   0xa   :  { %p584_p3 = scmp.ne.s32.totalorder %s36_s25, %s583_s12  ;;  %p589_p5 = scmp.lt.s32.totalorder %s583_s12, %s583_s12 }
   0xc   :  { %p590_p6 = por %p589_p5, %p588_p4 }
   0xe   :  { %p591_p7 = pnand %p590_p6, %p584_p3 }
  0x10   :  { %594 = shalt.err (!%p591_p7)
}
  0x11   :  { %s645_s13 = smov 64   ;;  %s646_s14 = smov 4  }
  0x12   :  { %41 = dma.hbm_to_vmem [thread:$0]  %s793_s3, 1024, %s36_s25, [#allocation5], %s645_s13, %s645_s13, %s646_s14  }
  0x13   :  { %s595_s19 = scalar_lea.hbm %s791_s1, 1024 }
  0x14   :  { %p596_p8 = scmp.ne.s32.totalorder %s791_s1, %s595_s19  ;;  %p599_p9 = scmp.lt.u32.totalorder %s595_s19, %s791_s1 }
  0x16   :  { %p601_p10 = pnand %p599_p9, %p596_p8 }
  0x18   :  { %604 = shalt.err (!%p601_p10)
}
  0x19   :  { %s605_s24 = scalar_lea.vmem %s690_s27, 1024  ;;  %p610_p12 = scmp.lt.s32.totalorder %s690_s27, %s690_s27 }
  0x1a   :  { %p606_p11 = scmp.ne.s32.totalorder %s690_s27, %s605_s24  ;;  %p611_p13 = scmp.lt.s32.totalorder %s605_s24, %s605_s24 }
  0x1c   :  { %p612_p0 = por %p611_p13, %p610_p12 }
  0x1e   :  { %p613_p1 = pnand %p612_p0, %p606_p11 }
  0x20   :  { %616 = shalt.err (!%p613_p1)
}
  0x21   :  { %27 = dma.hbm_to_vmem [thread:$0]  %s791_s1, 1024, %s690_s27, [#allocation3], %s645_s13, %s645_s13, %s646_s14  }
  0x22   :  { %s647_s26 = smov [#allocation6]   ;;  %s617_s8 = scalar_lea.hbm %s795_s5, 1024 }
  0x23   :  { %s49_s28 = sshll.u32 %s647_s26, 4  ;;  %p618_p2 = scmp.ne.s32.totalorder %s795_s5, %s617_s8  ;;  %s50_s28 = int_to_ptr.vmem [resolvable:$true] %s49_s28 }
  0x24   :  { %p621_p3 = scmp.lt.u32.totalorder %s617_s8, %s795_s5 }
  0x26   :  { %p623_p4 = pnand %p621_p3, %p618_p2 }
  0x28   :  { %626 = shalt.err (!%p623_p4)
}
  0x29   :  { %s627_s15 = scalar_lea.vmem %s50_s28, 1024  ;;  %p632_p6 = scmp.lt.s32.totalorder %s50_s28, %s50_s28 }
  0x2a   :  { %p628_p5 = scmp.ne.s32.totalorder %s50_s28, %s627_s15  ;;  %p633_p7 = scmp.lt.s32.totalorder %s627_s15, %s627_s15 }
  0x2c   :  { %p634_p8 = por %p633_p7, %p632_p6 }
  0x2e   :  { %p635_p9 = pnand %p634_p8, %p628_p5 }
  0x30   :  { %638 = shalt.err (!%p635_p9)
}
  0x31   :  { %55 = dma.hbm_to_vmem [thread:$0]  %s795_s5, 1024, %s50_s28, [#allocation5], %s645_s13, %s645_s13, %s646_s14  }
  0x32   :  { %639 = dma.done.wait [#allocation3], 1024  }
  0x33   :  { %640 = vsyncadd [#allocation3], 4294966272 }
  0x34   :  { %641 = dma.done.wait [#allocation5], 2048  }
  0x35   :  { %642 = vsyncadd [#allocation5], 4294965248  ;;  %v648_v0 = vmov 0.0   ;;  %vm649_vm0 = vmmov 0   ;;  %v548_v1 = vld [vmem:[#allocation2] sm:$0xff]   ;;  %v549_v2 = vld [vmem:[#allocation2 + $0x8] sm:$0xff]  }
  0x36   :  { %481 = vmatprep.subr.bf16.mxu0 %v648_v0  ;;  %497 = vmatprep.mubr.msk.bf16.mxu0 %vm649_vm0, %v648_v0  ;;  %v550_v3 = vld [vmem:[#allocation2 + $0x10] sm:$0xff]   ;;  %v557_v4 = vld [vmem:[#allocation4] sm:$0xff]   ;;  %v551_v5 = vld [vmem:[#allocation2 + $0x18] sm:$0xff]  }
  0x37   :  { %501 = vmatprep.subr.bf16.mxu1 %v648_v0  ;;  %517 = vmatprep.mubr.msk.bf16.mxu1 %vm649_vm0, %v648_v0  ;;  %v558_v6 = vld [vmem:[#allocation4 + $0x8] sm:$0xff]   ;;  %v552_v7 = vld [vmem:[#allocation2 + $0x20] sm:$0xff]   ;;  %v559_v8 = vld [vmem:[#allocation4 + $0x10] sm:$0xff]  }
  0x38   :  { %482 = vmatpush3.bf16.msra.mxu0 %v548_v1  ;;  %502 = vmatpush3.bf16.msra.mxu1 %v557_v4  ;;  %v553_v9 = vld [vmem:[#allocation2 + $0x28] sm:$0xff]   ;;  %v560_v10 = vld [vmem:[#allocation4 + $0x18] sm:$0xff]   ;;  %v554_v11 = vld [vmem:[#allocation2 + $0x30] sm:$0xff]  }
  0x39   :  { %483 = vmatprep.subr.bf16.mxu0 %v648_v0  ;;  %503 = vmatprep.subr.bf16.mxu1 %v648_v0  ;;  %v561_v12 = vld [vmem:[#allocation4 + $0x20] sm:$0xff]   ;;  %v555_v13 = vld [vmem:[#allocation2 + $0x38] sm:$0xff]   ;;  %v562_v14 = vld [vmem:[#allocation4 + $0x28] sm:$0xff]  }
  0x3a   :  { %v556_v15 = vld [vmem:[%s790_s0] sm:$0xff]   ;;  %v563_v16 = vld [vmem:[#allocation4 + $0x30] sm:$0xff]   ;;  %v564_v17 = vld [vmem:[#allocation4 + $0x38] sm:$0xff]  }
  0x3b   :  { %v565_v18 = vld [vmem:[#allocation6] sm:$0xff]   ;;  %v566_v19 = vld [vmem:[#allocation6 + $0x8] sm:$0xff]   ;;  %v567_v20 = vld [vmem:[#allocation6 + $0x10] sm:$0xff]  }
  0x3c   :  { %484 = vmatpush3.bf16.msra.mxu0 %v549_v2  ;;  %504 = vmatpush3.bf16.msra.mxu1 %v558_v6  ;;  %v568_v21 = vld [vmem:[#allocation6 + $0x18] sm:$0xff]   ;;  %v569_v22 = vld [vmem:[#allocation6 + $0x20] sm:$0xff]   ;;  %v570_v23 = vld [vmem:[#allocation6 + $0x28] sm:$0xff]  }
  0x3d   :  { %485 = vmatprep.subr.bf16.mxu0 %v648_v0  ;;  %505 = vmatprep.subr.bf16.mxu1 %v648_v0  ;;  %v426_v24 = vld [vmem:[%s792_s2] ss:$0 sm:$0xff]  ;;  %v571_v34 = vld [vmem:[#allocation6 + $0x30] sm:$0xff]   ;;  %v572_v35 = vld [vmem:[#allocation6 + $0x38] sm:$0xff]  }
  0x3e   :  { %v436_v36 = vld [vmem:[%s794_s4] ss:$0 sm:$0xff] }
  0x3f   :  { %v445_v46 = vld [vmem:[%s796_s6] ss:$0 sm:$0xff] }
  0x40   :  { %486 = vmatpush3.bf16.msra.mxu0 %v550_v3  ;;  %506 = vmatpush3.bf16.msra.mxu1 %v559_v8 }
  0x41   :  { %487 = vmatprep.subr.bf16.mxu0 %v648_v0  ;;  %507 = vmatprep.subr.bf16.mxu1 %v648_v0 }
  0x44   :  { %488 = vmatpush3.bf16.msra.mxu0 %v551_v5  ;;  %508 = vmatpush3.bf16.msra.mxu1 %v560_v10 }
  0x45   :  { %489 = vmatprep.subr.bf16.mxu0 %v648_v0  ;;  %509 = vmatprep.subr.bf16.mxu1 %v648_v0 }
  0x48   :  { %490 = vmatpush3.bf16.msra.mxu0 %v552_v7  ;;  %510 = vmatpush3.bf16.msra.mxu1 %v561_v12 }
  0x49   :  { %491 = vmatprep.subr.bf16.mxu0 %v648_v0  ;;  %511 = vmatprep.subr.bf16.mxu1 %v648_v0 }
  0x4c   :  { %492 = vmatpush3.bf16.msra.mxu0 %v553_v9  ;;  %512 = vmatpush3.bf16.msra.mxu1 %v562_v14 }
  0x4d   :  { %493 = vmatprep.subr.bf16.mxu0 %v648_v0  ;;  %513 = vmatprep.subr.bf16.mxu1 %v648_v0 }
  0x50   :  { %494 = vmatpush3.bf16.msra.mxu0 %v554_v11  ;;  %514 = vmatpush3.bf16.msra.mxu1 %v563_v16 }
  0x51   :  { %495 = vmatprep.subr.bf16.mxu0 %v648_v0  ;;  %515 = vmatprep.subr.bf16.mxu1 %v648_v0 }
  0x54   :  { %496 = vmatpush3.bf16.msra.mxu0 %v555_v13  ;;  %516 = vmatpush3.bf16.msra.mxu1 %v564_v17 }
  0x55   :  { %521 = vmatprep.subr.bf16.mxu0 %v648_v0 }
  0x57   :  { %498 = vmatmul.mubr.bf16.vlgmr.msra.gmra.mrb[0].mxu0 %v556_v15 }
  0x58   :  { %537 = vmatprep.mubr.msk.bf16.mxu0 %vm649_vm0, %v648_v0  ;;  %522 = vmatpush3.bf16.msra.mxu0 %v565_v18 }
  0x59   :  { %523 = vmatprep.subr.bf16.mxu0 %v648_v0 }
  0x5c   :  { %524 = vmatpush3.bf16.msra.mxu0 %v566_v19 }
  0x5d   :  { %525 = vmatprep.subr.bf16.mxu0 %v648_v0 }
  0x60   :  { %526 = vmatpush3.bf16.msra.mxu0 %v567_v20 }
  0x61   :  { %527 = vmatprep.subr.bf16.mxu0 %v648_v0 }
  0x64   :  { %528 = vmatpush3.bf16.msra.mxu0 %v568_v21 }
  0x65   :  { %529 = vmatprep.subr.bf16.mxu0 %v648_v0 }
  0x68   :  { %530 = vmatpush3.bf16.msra.mxu0 %v569_v22 }
  0x69   :  { %531 = vmatprep.subr.bf16.mxu0 %v648_v0 }
  0x6c   :  { %532 = vmatpush3.bf16.msra.mxu0 %v570_v23 }
  0x6d   :  { %533 = vmatprep.subr.bf16.mxu0 %v648_v0 }
  0x70   :  { %534 = vmatpush3.bf16.msra.mxu0 %v571_v34 }
  0x71   :  { %535 = vmatprep.subr.bf16.mxu0 %v648_v0 }
  0x74   :  { %536 = vmatpush3.bf16.msra.mxu0 %v572_v35 }
 0x12a   :  { %v181_v25 = vpop.f32.mrb[0].mxu0 }
 0x12b   :  { %v182_v26 = vadd.f32 %v426_v24, %v181_v25  ;;  %v499_v27 = vpop.f32.mrb[1].mxu0 }
 0x12c   :  { %v184_v28 = vpop.f32.mrb[2].mxu0 }
 0x12d   :  { %v185_v29 = vadd.f32 %v426_v24, %v184_v28  ;;  %v500_v30 = vpop.f32.mrb[3].mxu0  ;;  %v188_v31 = vmax.f32 %v182_v26, 0.0 }
 0x12f   :  { %v189_v32 = vmax.f32 %v185_v29, 0.0 }
 0x131   :  { %v190_v33 = vpack.c.bf16 %v189_v32, %v188_v31 }
 0x133   :  { %518 = vmatmul.mubr.bf16.vlgmr.msra.gmra.mrb[0].mxu1 %v190_v33 }
 0x206   :  { %v296_v37 = vpop.f32.mrb[0].mxu1 }
 0x207   :  { %v297_v38 = vadd.f32 %v436_v36, %v296_v37  ;;  %v519_v39 = vpop.f32.mrb[1].mxu1 }
 0x208   :  { %v299_v40 = vpop.f32.mrb[2].mxu1 }
 0x209   :  { %v300_v41 = vadd.f32 %v436_v36, %v299_v40  ;;  %v520_v42 = vpop.f32.mrb[3].mxu1  ;;  %v303_v43 = vmax.f32 %v297_v38, 0.0 }
 0x20b   :  { %v304_v44 = vmax.f32 %v300_v41, 0.0 }
 0x20d   :  { %v305_v45 = vpack.c.bf16 %v304_v44, %v303_v43 }
 0x20f   :  { %538 = vmatmul.mubr.bf16.vlgmr.msra.gmra.mrb[4].mxu0 %v305_v45 }
 0x2e2   :  { %v411_v47 = vpop.f32.mrb[4].mxu0 }
 0x2e3   :  { %v412_v48 = vadd.f32 %v445_v46, %v411_v47  ;;  %v539_v49 = vpop.f32.mrb[5].mxu0 }
 0x2e4   :  { %v414_v50 = vpop.f32.mrb[6].mxu0 }
 0x2e5   :  { %418 = vst [vmem:[%s797_s7] sm:$0xff] %v412_v48  ;;  %v415_v51 = vadd.f32 %v445_v46, %v414_v50  ;;  %v540_v52 = vpop.f32.mrb[7].mxu0 }
 0x2e7   :  { %419 = vst [vmem:[%s797_s7 + $0x8] sm:$0xff] %v415_v51 }
 0x2e8   :  { %424 = vsyncpa [#allocation3], 1 }
 0x2e9   :  { %425 = vsyncpa [#allocation5], 1 }

</bundles_post_ra>
